<compile_context>
chip_gen: v5e
topology: v5e:2x2
jax: 0.10.0
libtpu: 0.0.40
codegen_flags: <defaults>
</compile_context>

<pallas_src>
import functools

import jax
import jax.numpy as jnp
from jax.experimental import pallas as pl
from jax.experimental.pallas import tpu as pltpu


def _round_up(x: int, m: int) -> int:
    return (x + m - 1) // m * m


def _vmem_capacity_bytes() -> int:
    try:
        info = pltpu.get_tpu_info()
        cap = getattr(info, "vmem_capacity_bytes", None)
        if cap:
            return int(cap)
    except Exception:
        pass
    return 64 * 1024 * 1024  # conservative (v7x-sized) fallback


def _mdas_intervention_kernel(
    pos_ref,        # SMEM [B]          scalar-prefetch: base positions
    resid_hbm_ref,  # ANY  [B, L, D]    residual stream (aliased to output)
    src_ref,        # VMEM [B, D]       source representations
    tT_ref,         # VMEM [tk, D]      contiguous row slab of T^T
    mask_ref,       # VMEM [1, tk]      binary-mask tile (rotated basis)
    out_hbm_ref,    # ANY  [B, L, D]    output residual stream (same buffer)
    lhs_ref,        # VMEM [P, D] cdt   stacked [rows; src] LHS (resident)
    acc_ref,        # VMEM [B, D] f32   back-rotation accumulator
    staging_ref,    # VMEM [B, D]       gather landing / writeback staging
    copy_sems,      # DMA semaphores (B,)
    *,
    batch: int,
    training_mode: bool,
    temperature: float,
):
    k = pl.program_id(0)
    nk = pl.num_programs(0)
    B = batch
    cdt = tT_ref.dtype  # MXU input dtype (bf16 by default, f32 optional)

    @pl.when(k == 0)
    def _init():
        acc_ref[...] = jnp.zeros_like(acc_ref)
        # In-kernel gather of the B intervened rows straight out of HBM
        # (no wrapper-side XLA gather / extra HBM round trip of rows_BD).
        gathers = []
        for b in range(B):
            cp = pltpu.make_async_copy(
                resid_hbm_ref.at[b, pl.ds(pos_ref[b], 1), :],
                staging_ref.at[pl.ds(b, 1), :],
                copy_sems.at[b])
            cp.start()
            gathers.append(cp)
        for cp in gathers:
            cp.wait()
        # Stack [rows; src] once into a resident LHS so both forward rotations
        # share a single MXU weight push of each T slab.
        if lhs_ref.shape[0] > 2 * B:
            lhs_ref[...] = jnp.zeros_like(lhs_ref)
        lhs_ref[pl.ds(0, B), :] = staging_ref[...].astype(cdt)
        lhs_ref[pl.ds(B, B), :] = src_ref[...].astype(cdt)

    tT = tT_ref[...]  # [tk, D]: rows of T^T == the k-th column slab of T

    # Fused forward rotation ([rows; src] @ T[:, k-tile]) as one NT matmul,
    # f32 accumulation; no transpose materialized.
    rot = jax.lax.dot_general(
        lhs_ref[...], tT,
        dimension_numbers=(((1,), (1,)), ((), ())),
        preferred_element_type=jnp.float32)            # [P, tk] f32
    rot_resid = rot[0:B, :]                             # [B, tk]
    rot_src = rot[B:2 * B, :]                           # [B, tk]

    bm = mask_ref[...].astype(jnp.float32)              # [1, tk]
    if training_mode:
        mask = jax.nn.sigmoid(bm * (1.0 / temperature))
    else:
        mask = (bm > 0).astype(jnp.float32)

    # (1 - m) * rot_resid + m * rot_src as a single blend.
    blended = rot_resid + mask * (rot_src - rot_resid)  # [B, tk] f32

    # Back-rotation contribution: blended @ T[:, k-tile].T == blended @ tT.
    # NOTE: in the bf16 compute path `blended` is downcast before this matmul;
    # pass compute_dtype=jnp.float32 for a full-precision back-rotation.
    acc_ref[...] += jnp.dot(blended.astype(cdt), tT,
                            preferred_element_type=jnp.float32)

    # After the last K tile, scatter the modified rows back in place with small
    # per-row DMAs; every untouched row of the residual stream is preserved
    # because the output buffer aliases the input.
    @pl.when(k == nk - 1)
    def _finalize():
        staging_ref[...] = acc_ref[...].astype(staging_ref.dtype)
        copies = []
        for b in range(B):
            cp = pltpu.make_async_copy(
                staging_ref.at[pl.ds(b, 1), :],
                out_hbm_ref.at[b, pl.ds(pos_ref[b], 1), :],
                copy_sems.at[b])
            cp.start()
            copies.append(cp)
        for cp in copies:
            cp.wait()


def mdas_intervention(resid_BLD, source_rep_BD, base_pos_B, transform_matrix_DD,
                      binary_mask_D, *, training_mode: bool = False,
                      temperature: float = 0.01, compute_dtype=jnp.bfloat16):
    """Applies the MDAS intervention hook to the residual stream (in place).

    compute_dtype sets the MXU input dtype for T / the matmul operands
    (accumulation is always f32).  bf16 is the default — it is required for
    native MXU throughput on v7x and halves the DxD HBM stream on v5e/v6e;
    pass jnp.float32 for a tighter result.

    NOTE: input_output_aliases makes the in-place row scatter zero-copy only
    when the caller donates resid_BLD under jit; otherwise XLA inserts a
    defensive copy of the [B, L, D] buffer.
    """
    B, L, D = resid_BLD.shape

    # Mirror the hook's decode-step early exit.
    if L == 1:
        return resid_BLD

    cdt = (jnp.dtype(compute_dtype) if compute_dtype is not None
           else jnp.dtype(transform_matrix_DD.dtype))
    t_isz = cdt.itemsize

    # Feed T pre-transposed so the k-th tile is a fully contiguous (tk, D) row
    # slab of T^T (avoids the strided column-slab DMA; matters most on v5e).
    # In production, cache this transpose alongside the parameter.
    t_t = jnp.transpose(transform_matrix_DD).astype(cdt)           # [D_rot, D]
    mask_2d = binary_mask_D.astype(jnp.float32).reshape(1, D)
    pos_i32 = base_pos_B.astype(jnp.int32)

    # Pad the rotated dimension to a multiple of 128: zero rows of T^T make the
    # padded rotated coordinates contribute exactly nothing, so this only fixes
    # tiling (never fall back to an un-pipelined, resident DxD block).
    Dk = _round_up(D, 128)
    if Dk != D:
        t_t = jnp.pad(t_t, ((0, Dk - D), (0, 0)))
        mask_2d = jnp.pad(mask_2d, ((0, 0), (0, Dk - D)))

    # MXU-friendly stacked-LHS row count (8 rows/sublane group f32, 16 bf16);
    # the stack is padded once, not per half.
    sub = 16 if t_isz == 2 else 8
    P = _round_up(2 * B, sub)

    # Generation-aware tile of the rotated dimension: largest tk whose
    # double-buffered (tk, D) T^T slab fits this chip's VMEM with headroom.
    vmem_cap = _vmem_capacity_bytes()
    fixed_bytes = (2 * B * D * source_rep_BD.dtype.itemsize   # src (dbl-buffered)
                   + P * D * t_isz                            # stacked LHS
                   + B * D * 4                                # f32 accumulator
                   + B * D * resid_BLD.dtype.itemsize         # staging
                   + 4 * 2048 * 4)                            # mask tiles
    slab_budget = max(vmem_cap - fixed_bytes - (16 << 20), 8 << 20)
    tk = 128
    for cand in (2048, 1024, 512, 256, 128):
        if Dk % cand == 0 and 2 * cand * D * t_isz <= slab_budget:
            tk = cand
            break
    num_k = Dk // tk
    vmem_limit = int(min(vmem_cap,
                         max(32 << 20, 2 * tk * D * t_isz + fixed_bytes + (8 << 20))))

    kernel = functools.partial(_mdas_intervention_kernel,
                               batch=B,
                               training_mode=training_mode,
                               temperature=temperature)

    grid_spec = pltpu.PrefetchScalarGridSpec(
        num_scalar_prefetch=1,
        grid=(num_k,),
        in_specs=[
            pl.BlockSpec(memory_space=pl.ANY),               # resid_BLD (aliased)
            pl.BlockSpec((B, D), lambda k, pos: (0, 0)),     # source reps
            # TODO(synk): on v5e, if profiling shows exposed T^T slab DMA gaps,
            # add pipeline_mode=pl.Buffered(3) here (VMEM is plentiful there).
            pl.BlockSpec((tk, D), lambda k, pos: (k, 0)),    # T^T row slab
            pl.BlockSpec((1, tk), lambda k, pos: (0, k)),    # mask tile
        ],
        out_specs=pl.BlockSpec(memory_space=pl.ANY),
        scratch_shapes=[
            pltpu.VMEM((P, D), cdt),                 # stacked [rows; src] LHS
            pltpu.VMEM((B, D), jnp.float32),         # f32 accumulator
            pltpu.VMEM((B, D), resid_BLD.dtype),     # gather/writeback staging
            pltpu.SemaphoreType.DMA((B,)),           # per-row copy semaphores
        ],
    )

    cost = pl.CostEstimate(
        flops=2 * (P + B) * D * Dk,
        transcendentals=Dk if training_mode else 0,
        bytes_accessed=Dk * D * t_isz + 4 * B * D * resid_BLD.dtype.itemsize)

    return pl.pallas_call(
        kernel,
        grid_spec=grid_spec,
        out_shape=jax.ShapeDtypeStruct(resid_BLD.shape, resid_BLD.dtype),
        # Output aliases resid_BLD (flat input index 1; the scalar-prefetch arg
        # is index 0), so only the B intervened rows are written.  Donate
        # resid_BLD under jit to make the aliasing a true zero-copy update.
        input_output_aliases={1: 0},
        compiler_params=pltpu.CompilerParams(
            dimension_semantics=("arbitrary",),
            vmem_limit_bytes=vmem_limit,
        ),
        cost_estimate=cost,
    )(pos_i32, resid_BLD, source_rep_BD, t_t, mask_2d)


def _reference_intervention(resid_BLD, source_rep_BD, base_pos_B, T, bm,
                            training_mode, temperature):
    """Plain-JAX mirror of the PyTorch hook, for correctness checking."""
    B = resid_BLD.shape[0]
    if resid_BLD.shape[1] == 1:
        return resid_BLD
    idx = jnp.arange(B)
    resid_BD = resid_BLD[idx, base_pos_B, :].astype(jnp.float32)
    Tf = T.astype(jnp.float32)
    rot_src = source_rep_BD.astype(jnp.float32) @ Tf
    rot_res = resid_BD @ Tf
    if training_mode:
        m = jax.nn.sigmoid(bm.astype(jnp.float32) / temperature)
    else:
        m = (bm > 0).astype(jnp.float32)
    mod = (1.0 - m) * rot_res + m * rot_src
    mod = mod @ Tf.T
    return resid_BLD.at[idx, base_pos_B, :].set(mod.astype(resid_BLD.dtype))


if __name__ == "__main__":
    # Small shapes consistent with the module: B=batch, L=seq, D=hidden.
    B, L = 4, 8
    temperature = 0.01
    key = jax.random.PRNGKey(0)

    # D=128 -> single K step; D=384 -> tk=128, 3-step K reduction (exercises
    # the accumulator init/finalize path across grid steps).
    for D in (128, 384):
        key, k_resid, k_src, k_pos, k_t, k_m = jax.random.split(key, 6)
        resid_BLD = jax.random.normal(k_resid, (B, L, D), dtype=jnp.float32)
        source_rep_BD = jax.random.normal(k_src, (B, D), dtype=jnp.float32)
        base_pos_B = jax.random.randint(k_pos, (B,), 0, L, dtype=jnp.int32)
        # Non-trivial parameters (the module inits eye / zeros, which would
        # make the test vacuous); scaled so activations stay O(1).
        transform_matrix_DD = (jax.random.normal(k_t, (D, D), dtype=jnp.float32)
                               * (1.0 / float(D) ** 0.5))
        binary_mask_D = jax.random.normal(k_m, (D,), dtype=jnp.float32)

        for training_mode in (True, False):
            ref = _reference_intervention(
                resid_BLD, source_rep_BD, base_pos_B, transform_matrix_DD,
                binary_mask_D, training_mode, temperature)

            # Default path: bf16 MXU inputs, f32 accumulation.
            out = jax.block_until_ready(mdas_intervention(
                resid_BLD, source_rep_BD, base_pos_B, transform_matrix_DD,
                binary_mask_D, training_mode=training_mode,
                temperature=temperature))
            assert out.shape == resid_BLD.shape and out.dtype == resid_BLD.dtype
            md = float(jnp.max(jnp.abs(out - ref)))
            assert bool(jnp.allclose(out, ref, atol=1e-1, rtol=1e-1)), (
                f"bf16 mismatch (D={D}, training={training_mode}): max|diff|={md}")

            # Full-precision path.
            out32 = jax.block_until_ready(mdas_intervention(
                resid_BLD, source_rep_BD, base_pos_B, transform_matrix_DD,
                binary_mask_D, training_mode=training_mode,
                temperature=temperature, compute_dtype=jnp.float32))
            md32 = float(jnp.max(jnp.abs(out32 - ref)))
            assert bool(jnp.allclose(out32, ref, atol=3e-2, rtol=3e-2)), (
                f"f32 mismatch (D={D}, training={training_mode}): max|diff|={md32}")

    print("KERNEL_OK")
</pallas_src>

<mosaic_0001>
module attributes {stable_mosaic.version = 11 : i64} {
  func.func @_mdas_intervention_kernel(%arg0: i32, %arg1: memref<4xi32, #tpu.memory_space<smem>>, %arg2: memref<4x8x128xf32, #tpu.memory_space<any>>, %arg3: memref<4x128xf32, #tpu.memory_space<vmem>>, %arg4: memref<128x128xbf16, #tpu.memory_space<vmem>>, %arg5: memref<1x128xf32, #tpu.memory_space<vmem>>, %arg6: memref<4x8x128xf32, #tpu.memory_space<any>>, %arg7: memref<16x128xbf16, #tpu.memory_space<vmem>>, %arg8: memref<4x128xf32, #tpu.memory_space<vmem>>, %arg9: memref<4x128xf32, #tpu.memory_space<vmem>>, %arg10: memref<4x!tpu.dma_semaphore, #tpu.memory_space<semaphore_mem>>) attributes {dimension_semantics = [#tpu.dimension_semantics<arbitrary>], iteration_bounds = array<i64: 1>, scalar_prefetch = 1 : i64, scratch_operands = 4 : i64, tpu.core_type = #tpu.core_type<tc>, window_params = [{}, {pipeline_mode = #tpu.pipeline_mode<synchronous>, transform_indices = @transform_1, window_bounds = array<i64: 4, 128>}, {transform_indices = @transform_2, window_bounds = array<i64: 128, 128>}, {transform_indices = @transform_3, window_bounds = array<i64: 1, 128>}, {}]} {
    %c0_i32 = arith.constant 0 : i32
    %0 = arith.cmpi eq, %arg0, %c0_i32 : i32
    %1 = arith.extui %0 : i1 to i32
    %c0_i32_0 = arith.constant 0 : i32
    %2 = arith.cmpi ne, %1, %c0_i32_0 : i32
    scf.if %2 {
      %cst_15 = arith.constant 0.000000e+00 : f32
      %28 = vector.broadcast %cst_15 : f32 to vector<4x128xf32>
      %c0_16 = arith.constant 0 : index
      %c0_17 = arith.constant 0 : index
      %29 = vector.load %arg8[%c0_16, %c0_17] : memref<4x128xf32, #tpu.memory_space<vmem>>, vector<4x128xf32>
      tpu.vector_store %arg8[%c0_16, %c0_17], %28 {strides = array<i32>} : memref<4x128xf32, #tpu.memory_space<vmem>>, vector<4x128xf32>,
      %c0_18 = arith.constant 0 : index
      %30 = memref.load %arg1[%c0_18] : memref<4xi32, #tpu.memory_space<smem>>
      %c0_i32_19 = arith.constant 0 : i32
      %c0_i32_20 = arith.constant 0 : i32
      %c0_i32_21 = arith.constant 0 : i32
      %31 = tpu.memref_slice %arg2[%c0_i32_19, %30, %c0_i32_21] : memref<4x8x128xf32, #tpu.memory_space<any>> -> memref<1x1x128xf32, #tpu.memory_space<any>>
      %32 = tpu.memref_squeeze %31 : memref<1x1x128xf32, #tpu.memory_space<any>> -> memref<1x128xf32, #tpu.memory_space<any>>
      %c0_i32_22 = arith.constant 0 : i32
      %c0_i32_23 = arith.constant 0 : i32
      %33 = tpu.memref_slice %arg9[%c0_i32_22, %c0_i32_23] : memref<4x128xf32, #tpu.memory_space<vmem>> -> memref<1x128xf32, #tpu.memory_space<vmem>>
      %34 = tpu.memref_slice %arg10[%c0_i32_20] : memref<4x!tpu.dma_semaphore, #tpu.memory_space<semaphore_mem>> -> memref<1x!tpu.dma_semaphore, #tpu.memory_space<semaphore_mem>>
      %35 = tpu.memref_squeeze %34 : memref<1x!tpu.dma_semaphore, #tpu.memory_space<semaphore_mem>> -> memref<!tpu.dma_semaphore, #tpu.memory_space<semaphore_mem>>
      tpu.enqueue_dma source(%32 : memref<1x128xf32, #tpu.memory_space<any>>) target(%33 : memref<1x128xf32, #tpu.memory_space<vmem>>) target_semaphore(%35 : memref<!tpu.dma_semaphore, #tpu.memory_space<semaphore_mem>>)
      %c1 = arith.constant 1 : index
      %36 = memref.load %arg1[%c1] : memref<4xi32, #tpu.memory_space<smem>>
      %c1_i32 = arith.constant 1 : i32
      %c1_i32_24 = arith.constant 1 : i32
      %c0_i32_25 = arith.constant 0 : i32
      %37 = tpu.memref_slice %arg2[%c1_i32, %36, %c0_i32_25] : memref<4x8x128xf32, #tpu.memory_space<any>> -> memref<1x1x128xf32, #tpu.memory_space<any>>
      %38 = tpu.memref_squeeze %37 : memref<1x1x128xf32, #tpu.memory_space<any>> -> memref<1x128xf32, #tpu.memory_space<any>>
      %c1_i32_26 = arith.constant 1 : i32
      %c0_i32_27 = arith.constant 0 : i32
      %39 = tpu.memref_slice %arg9[%c1_i32_26, %c0_i32_27] : memref<4x128xf32, #tpu.memory_space<vmem>> -> memref<1x128xf32, #tpu.memory_space<vmem>>
      %40 = tpu.memref_slice %arg10[%c1_i32_24] : memref<4x!tpu.dma_semaphore, #tpu.memory_space<semaphore_mem>> -> memref<1x!tpu.dma_semaphore, #tpu.memory_space<semaphore_mem>>
      %41 = tpu.memref_squeeze %40 : memref<1x!tpu.dma_semaphore, #tpu.memory_space<semaphore_mem>> -> memref<!tpu.dma_semaphore, #tpu.memory_space<semaphore_mem>>
      tpu.enqueue_dma source(%38 : memref<1x128xf32, #tpu.memory_space<any>>) target(%39 : memref<1x128xf32, #tpu.memory_space<vmem>>) target_semaphore(%41 : memref<!tpu.dma_semaphore, #tpu.memory_space<semaphore_mem>>)
      %c2 = arith.constant 2 : index
      %42 = memref.load %arg1[%c2] : memref<4xi32, #tpu.memory_space<smem>>
      %c2_i32 = arith.constant 2 : i32
      %c2_i32_28 = arith.constant 2 : i32
      %c0_i32_29 = arith.constant 0 : i32
      %43 = tpu.memref_slice %arg2[%c2_i32, %42, %c0_i32_29] : memref<4x8x128xf32, #tpu.memory_space<any>> -> memref<1x1x128xf32, #tpu.memory_space<any>>
      %44 = tpu.memref_squeeze %43 : memref<1x1x128xf32, #tpu.memory_space<any>> -> memref<1x128xf32, #tpu.memory_space<any>>
      %c2_i32_30 = arith.constant 2 : i32
      %c0_i32_31 = arith.constant 0 : i32
      %45 = tpu.memref_slice %arg9[%c2_i32_30, %c0_i32_31] : memref<4x128xf32, #tpu.memory_space<vmem>> -> memref<1x128xf32, #tpu.memory_space<vmem>>
      %46 = tpu.memref_slice %arg10[%c2_i32_28] : memref<4x!tpu.dma_semaphore, #tpu.memory_space<semaphore_mem>> -> memref<1x!tpu.dma_semaphore, #tpu.memory_space<semaphore_mem>>
      %47 = tpu.memref_squeeze %46 : memref<1x!tpu.dma_semaphore, #tpu.memory_space<semaphore_mem>> -> memref<!tpu.dma_semaphore, #tpu.memory_space<semaphore_mem>>
      tpu.enqueue_dma source(%44 : memref<1x128xf32, #tpu.memory_space<any>>) target(%45 : memref<1x128xf32, #tpu.memory_space<vmem>>) target_semaphore(%47 : memref<!tpu.dma_semaphore, #tpu.memory_space<semaphore_mem>>)
      %c3 = arith.constant 3 : index
      %48 = memref.load %arg1[%c3] : memref<4xi32, #tpu.memory_space<smem>>
      %c3_i32 = arith.constant 3 : i32
      %c3_i32_32 = arith.constant 3 : i32
      %c0_i32_33 = arith.constant 0 : i32
      %49 = tpu.memref_slice %arg2[%c3_i32, %48, %c0_i32_33] : memref<4x8x128xf32, #tpu.memory_space<any>> -> memref<1x1x128xf32, #tpu.memory_space<any>>
      %50 = tpu.memref_squeeze %49 : memref<1x1x128xf32, #tpu.memory_space<any>> -> memref<1x128xf32, #tpu.memory_space<any>>
      %c3_i32_34 = arith.constant 3 : i32
      %c0_i32_35 = arith.constant 0 : i32
      %51 = tpu.memref_slice %arg9[%c3_i32_34, %c0_i32_35] : memref<4x128xf32, #tpu.memory_space<vmem>> -> memref<1x128xf32, #tpu.memory_space<vmem>>
      %52 = tpu.memref_slice %arg10[%c3_i32_32] : memref<4x!tpu.dma_semaphore, #tpu.memory_space<semaphore_mem>> -> memref<1x!tpu.dma_semaphore, #tpu.memory_space<semaphore_mem>>
      %53 = tpu.memref_squeeze %52 : memref<1x!tpu.dma_semaphore, #tpu.memory_space<semaphore_mem>> -> memref<!tpu.dma_semaphore, #tpu.memory_space<semaphore_mem>>
      tpu.enqueue_dma source(%50 : memref<1x128xf32, #tpu.memory_space<any>>) target(%51 : memref<1x128xf32, #tpu.memory_space<vmem>>) target_semaphore(%53 : memref<!tpu.dma_semaphore, #tpu.memory_space<semaphore_mem>>)
      %c0_i32_36 = arith.constant 0 : i32
      %c0_i32_37 = arith.constant 0 : i32
      %c0_i32_38 = arith.constant 0 : i32
      %54 = tpu.memref_slice %arg2[%c0_i32_36, %30, %c0_i32_38] : memref<4x8x128xf32, #tpu.memory_space<any>> -> memref<1x1x128xf32, #tpu.memory_space<any>>
      %55 = tpu.memref_squeeze %54 : memref<1x1x128xf32, #tpu.memory_space<any>> -> memref<1x128xf32, #tpu.memory_space<any>>
      %c0_i32_39 = arith.constant 0 : i32
      %c0_i32_40 = arith.constant 0 : i32
      %56 = tpu.memref_slice %arg9[%c0_i32_39, %c0_i32_40] : memref<4x128xf32, #tpu.memory_space<vmem>> -> memref<1x128xf32, #tpu.memory_space<vmem>>
      %57 = tpu.memref_slice %arg10[%c0_i32_37] : memref<4x!tpu.dma_semaphore, #tpu.memory_space<semaphore_mem>> -> memref<1x!tpu.dma_semaphore, #tpu.memory_space<semaphore_mem>>
      %58 = tpu.memref_squeeze %57 : memref<1x!tpu.dma_semaphore, #tpu.memory_space<semaphore_mem>> -> memref<!tpu.dma_semaphore, #tpu.memory_space<semaphore_mem>>
      tpu.wait_dma2 semaphore(%58 : memref<!tpu.dma_semaphore, #tpu.memory_space<semaphore_mem>>) src(%55 : memref<1x128xf32, #tpu.memory_space<any>>) dst(%56 : memref<1x128xf32, #tpu.memory_space<vmem>>)
      %c1_i32_41 = arith.constant 1 : i32
      %c1_i32_42 = arith.constant 1 : i32
      %c0_i32_43 = arith.constant 0 : i32
      %59 = tpu.memref_slice %arg2[%c1_i32_41, %36, %c0_i32_43] : memref<4x8x128xf32, #tpu.memory_space<any>> -> memref<1x1x128xf32, #tpu.memory_space<any>>
      %60 = tpu.memref_squeeze %59 : memref<1x1x128xf32, #tpu.memory_space<any>> -> memref<1x128xf32, #tpu.memory_space<any>>
      %c1_i32_44 = arith.constant 1 : i32
      %c0_i32_45 = arith.constant 0 : i32
      %61 = tpu.memref_slice %arg9[%c1_i32_44, %c0_i32_45] : memref<4x128xf32, #tpu.memory_space<vmem>> -> memref<1x128xf32, #tpu.memory_space<vmem>>
      %62 = tpu.memref_slice %arg10[%c1_i32_42] : memref<4x!tpu.dma_semaphore, #tpu.memory_space<semaphore_mem>> -> memref<1x!tpu.dma_semaphore, #tpu.memory_space<semaphore_mem>>
      %63 = tpu.memref_squeeze %62 : memref<1x!tpu.dma_semaphore, #tpu.memory_space<semaphore_mem>> -> memref<!tpu.dma_semaphore, #tpu.memory_space<semaphore_mem>>
      tpu.wait_dma2 semaphore(%63 : memref<!tpu.dma_semaphore, #tpu.memory_space<semaphore_mem>>) src(%60 : memref<1x128xf32, #tpu.memory_space<any>>) dst(%61 : memref<1x128xf32, #tpu.memory_space<vmem>>)
      %c2_i32_46 = arith.constant 2 : i32
      %c2_i32_47 = arith.constant 2 : i32
      %c0_i32_48 = arith.constant 0 : i32
      %64 = tpu.memref_slice %arg2[%c2_i32_46, %42, %c0_i32_48] : memref<4x8x128xf32, #tpu.memory_space<any>> -> memref<1x1x128xf32, #tpu.memory_space<any>>
      %65 = tpu.memref_squeeze %64 : memref<1x1x128xf32, #tpu.memory_space<any>> -> memref<1x128xf32, #tpu.memory_space<any>>
      %c2_i32_49 = arith.constant 2 : i32
      %c0_i32_50 = arith.constant 0 : i32
      %66 = tpu.memref_slice %arg9[%c2_i32_49, %c0_i32_50] : memref<4x128xf32, #tpu.memory_space<vmem>> -> memref<1x128xf32, #tpu.memory_space<vmem>>
      %67 = tpu.memref_slice %arg10[%c2_i32_47] : memref<4x!tpu.dma_semaphore, #tpu.memory_space<semaphore_mem>> -> memref<1x!tpu.dma_semaphore, #tpu.memory_space<semaphore_mem>>
      %68 = tpu.memref_squeeze %67 : memref<1x!tpu.dma_semaphore, #tpu.memory_space<semaphore_mem>> -> memref<!tpu.dma_semaphore, #tpu.memory_space<semaphore_mem>>
      tpu.wait_dma2 semaphore(%68 : memref<!tpu.dma_semaphore, #tpu.memory_space<semaphore_mem>>) src(%65 : memref<1x128xf32, #tpu.memory_space<any>>) dst(%66 : memref<1x128xf32, #tpu.memory_space<vmem>>)
      %c3_i32_51 = arith.constant 3 : i32
      %c3_i32_52 = arith.constant 3 : i32
      %c0_i32_53 = arith.constant 0 : i32
      %69 = tpu.memref_slice %arg2[%c3_i32_51, %48, %c0_i32_53] : memref<4x8x128xf32, #tpu.memory_space<any>> -> memref<1x1x128xf32, #tpu.memory_space<any>>
      %70 = tpu.memref_squeeze %69 : memref<1x1x128xf32, #tpu.memory_space<any>> -> memref<1x128xf32, #tpu.memory_space<any>>
      %c3_i32_54 = arith.constant 3 : i32
      %c0_i32_55 = arith.constant 0 : i32
      %71 = tpu.memref_slice %arg9[%c3_i32_54, %c0_i32_55] : memref<4x128xf32, #tpu.memory_space<vmem>> -> memref<1x128xf32, #tpu.memory_space<vmem>>
      %72 = tpu.memref_slice %arg10[%c3_i32_52] : memref<4x!tpu.dma_semaphore, #tpu.memory_space<semaphore_mem>> -> memref<1x!tpu.dma_semaphore, #tpu.memory_space<semaphore_mem>>
      %73 = tpu.memref_squeeze %72 : memref<1x!tpu.dma_semaphore, #tpu.memory_space<semaphore_mem>> -> memref<!tpu.dma_semaphore, #tpu.memory_space<semaphore_mem>>
      tpu.wait_dma2 semaphore(%73 : memref<!tpu.dma_semaphore, #tpu.memory_space<semaphore_mem>>) src(%70 : memref<1x128xf32, #tpu.memory_space<any>>) dst(%71 : memref<1x128xf32, #tpu.memory_space<vmem>>)
      %cst_56 = arith.constant 0.000000e+00 : bf16
      %74 = vector.broadcast %cst_56 : bf16 to vector<16x128xbf16>
      %c0_57 = arith.constant 0 : index
      %c0_58 = arith.constant 0 : index
      %75 = vector.load %arg7[%c0_57, %c0_58] : memref<16x128xbf16, #tpu.memory_space<vmem>>, vector<16x128xbf16>
      tpu.vector_store %arg7[%c0_57, %c0_58], %74 {strides = array<i32>} : memref<16x128xbf16, #tpu.memory_space<vmem>>, vector<16x128xbf16>,
      %c0_59 = arith.constant 0 : index
      %c0_60 = arith.constant 0 : index
      %76 = vector.load %arg9[%c0_59, %c0_60] : memref<4x128xf32, #tpu.memory_space<vmem>>, vector<4x128xf32>
      %77 = arith.truncf %76 : vector<4x128xf32> to vector<4x128xbf16>
      %c0_61 = arith.constant 0 : index
      %c0_62 = arith.constant 0 : index
      %78 = vector.load %arg7[%c0_61, %c0_62] : memref<16x128xbf16, #tpu.memory_space<vmem>>, vector<4x128xbf16>
      tpu.vector_store %arg7[%c0_61, %c0_62], %77 {strides = array<i32>} : memref<16x128xbf16, #tpu.memory_space<vmem>>, vector<4x128xbf16>,
      %c0_63 = arith.constant 0 : index
      %c0_64 = arith.constant 0 : index
      %79 = vector.load %arg3[%c0_63, %c0_64] : memref<4x128xf32, #tpu.memory_space<vmem>>, vector<4x128xf32>
      %80 = arith.truncf %79 : vector<4x128xf32> to vector<4x128xbf16>
      %c4 = arith.constant 4 : index
      %c0_65 = arith.constant 0 : index
      %81 = vector.load %arg7[%c4, %c0_65] : memref<16x128xbf16, #tpu.memory_space<vmem>>, vector<4x128xbf16>
      tpu.vector_store %arg7[%c4, %c0_65], %80 {strides = array<i32>} : memref<16x128xbf16, #tpu.memory_space<vmem>>, vector<4x128xbf16>,
    } else {
    }
    %c0 = arith.constant 0 : index
    %c0_1 = arith.constant 0 : index
    %3 = vector.load %arg4[%c0, %c0_1] : memref<128x128xbf16, #tpu.memory_space<vmem>>, vector<128x128xbf16>
    %c0_2 = arith.constant 0 : index
    %c0_3 = arith.constant 0 : index
    %4 = vector.load %arg7[%c0_2, %c0_3] : memref<16x128xbf16, #tpu.memory_space<vmem>>, vector<16x128xbf16>
    %cst = arith.constant dense<0.000000e+00> : vector<16x128xf32>
    %5 = tpu.matmul %4, %3, %cst {dimension_numbers = #tpu.dot_dimension_numbers<[1], [1], [0], [0], [0, 0, 1, 0], [], []>} : vector<16x128xbf16>, vector<128x128xbf16>, vector<16x128xf32> -> vector<16x128xf32>
    %6 = vector.extract_strided_slice %5 {offsets = [0, 0], sizes = [4, 128], strides = [1, 1]} : vector<16x128xf32> to vector<4x128xf32>
    %7 = vector.extract_strided_slice %5 {offsets = [4, 0], sizes = [4, 128], strides = [1, 1]} : vector<16x128xf32> to vector<4x128xf32>
    %c0_4 = arith.constant 0 : index
    %c0_5 = arith.constant 0 : index
    %8 = vector.load %arg5[%c0_4, %c0_5] : memref<1x128xf32, #tpu.memory_space<vmem>>, vector<1x128xf32>
    %cst_6 = arith.constant 1.000000e+02 : f32
    %9 = vector.broadcast %cst_6 : f32 to vector<1x128xf32>
    %10 = arith.mulf %8, %9 : vector<1x128xf32>
    %11 = arith.negf %10 : vector<1x128xf32>
    %12 = math.exp %11 : vector<1x128xf32>
    %cst_7 = arith.constant 1.000000e+00 : f32
    %13 = vector.broadcast %cst_7 : f32 to vector<1x128xf32>
    %14 = arith.addf %13, %12 : vector<1x128xf32>
    %15 = arith.divf %13, %14 : vector<1x128xf32>
    %16 = arith.subf %7, %6 : vector<4x128xf32>
    %17 = vector.broadcast %15 : vector<1x128xf32> to vector<4x128xf32>
    %18 = arith.mulf %17, %16 : vector<4x128xf32>
    %19 = arith.addf %6, %18 : vector<4x128xf32>
    %c0_8 = arith.constant 0 : index
    %c0_9 = arith.constant 0 : index
    %20 = vector.load %arg8[%c0_8, %c0_9] : memref<4x128xf32, #tpu.memory_space<vmem>>, vector<4x128xf32>
    %21 = arith.truncf %19 : vector<4x128xf32> to vector<4x128xbf16>
    %cst_10 = arith.constant dense<0.000000e+00> : vector<4x128xf32>
    %22 = tpu.matmul %21, %3, %cst_10 {dimension_numbers = #tpu.dot_dimension_numbers<[1], [0], [0], [1], [0, 0, 1, 1], [], []>} : vector<4x128xbf16>, vector<128x128xbf16>, vector<4x128xf32> -> vector<4x128xf32>
    %23 = arith.addf %20, %22 : vector<4x128xf32>
    %c0_11 = arith.constant 0 : index
    %c0_12 = arith.constant 0 : index
    %24 = vector.load %arg8[%c0_11, %c0_12] : memref<4x128xf32, #tpu.memory_space<vmem>>, vector<4x128xf32>
    tpu.vector_store %arg8[%c0_11, %c0_12], %23 {strides = array<i32>} : memref<4x128xf32, #tpu.memory_space<vmem>>, vector<4x128xf32>,
    %c0_i32_13 = arith.constant 0 : i32
    %25 = arith.cmpi eq, %arg0, %c0_i32_13 : i32
    %26 = arith.extui %25 : i1 to i32
    %c0_i32_14 = arith.constant 0 : i32
    %27 = arith.cmpi ne, %26, %c0_i32_14 : i32
    scf.if %27 {
      %c0_15 = arith.constant 0 : index
      %c0_16 = arith.constant 0 : index
      %28 = vector.load %arg8[%c0_15, %c0_16] : memref<4x128xf32, #tpu.memory_space<vmem>>, vector<4x128xf32>
      %c0_17 = arith.constant 0 : index
      %c0_18 = arith.constant 0 : index
      %29 = vector.load %arg9[%c0_17, %c0_18] : memref<4x128xf32, #tpu.memory_space<vmem>>, vector<4x128xf32>
      tpu.vector_store %arg9[%c0_17, %c0_18], %28 {strides = array<i32>} : memref<4x128xf32, #tpu.memory_space<vmem>>, vector<4x128xf32>,
      %c0_19 = arith.constant 0 : index
      %30 = memref.load %arg1[%c0_19] : memref<4xi32, #tpu.memory_space<smem>>
      %c0_i32_20 = arith.constant 0 : i32
      %c0_i32_21 = arith.constant 0 : i32
      %c0_i32_22 = arith.constant 0 : i32
      %c0_i32_23 = arith.constant 0 : i32
      %31 = tpu.memref_slice %arg9[%c0_i32_22, %c0_i32_23] : memref<4x128xf32, #tpu.memory_space<vmem>> -> memref<1x128xf32, #tpu.memory_space<vmem>>
      %c0_i32_24 = arith.constant 0 : i32
      %32 = tpu.memref_slice %arg6[%c0_i32_20, %30, %c0_i32_24] : memref<4x8x128xf32, #tpu.memory_space<any>> -> memref<1x1x128xf32, #tpu.memory_space<any>>
      %33 = tpu.memref_squeeze %32 : memref<1x1x128xf32, #tpu.memory_space<any>> -> memref<1x128xf32, #tpu.memory_space<any>>
      %34 = tpu.memref_slice %arg10[%c0_i32_21] : memref<4x!tpu.dma_semaphore, #tpu.memory_space<semaphore_mem>> -> memref<1x!tpu.dma_semaphore, #tpu.memory_space<semaphore_mem>>
      %35 = tpu.memref_squeeze %34 : memref<1x!tpu.dma_semaphore, #tpu.memory_space<semaphore_mem>> -> memref<!tpu.dma_semaphore, #tpu.memory_space<semaphore_mem>>
      tpu.enqueue_dma source(%31 : memref<1x128xf32, #tpu.memory_space<vmem>>) target(%33 : memref<1x128xf32, #tpu.memory_space<any>>) target_semaphore(%35 : memref<!tpu.dma_semaphore, #tpu.memory_space<semaphore_mem>>)
      %c1 = arith.constant 1 : index
      %36 = memref.load %arg1[%c1] : memref<4xi32, #tpu.memory_space<smem>>
      %c1_i32 = arith.constant 1 : i32
      %c1_i32_25 = arith.constant 1 : i32
      %c1_i32_26 = arith.constant 1 : i32
      %c0_i32_27 = arith.constant 0 : i32
      %37 = tpu.memref_slice %arg9[%c1_i32_26, %c0_i32_27] : memref<4x128xf32, #tpu.memory_space<vmem>> -> memref<1x128xf32, #tpu.memory_space<vmem>>
      %c0_i32_28 = arith.constant 0 : i32
      %38 = tpu.memref_slice %arg6[%c1_i32, %36, %c0_i32_28] : memref<4x8x128xf32, #tpu.memory_space<any>> -> memref<1x1x128xf32, #tpu.memory_space<any>>
      %39 = tpu.memref_squeeze %38 : memref<1x1x128xf32, #tpu.memory_space<any>> -> memref<1x128xf32, #tpu.memory_space<any>>
      %40 = tpu.memref_slice %arg10[%c1_i32_25] : memref<4x!tpu.dma_semaphore, #tpu.memory_space<semaphore_mem>> -> memref<1x!tpu.dma_semaphore, #tpu.memory_space<semaphore_mem>>
      %41 = tpu.memref_squeeze %40 : memref<1x!tpu.dma_semaphore, #tpu.memory_space<semaphore_mem>> -> memref<!tpu.dma_semaphore, #tpu.memory_space<semaphore_mem>>
      tpu.enqueue_dma source(%37 : memref<1x128xf32, #tpu.memory_space<vmem>>) target(%39 : memref<1x128xf32, #tpu.memory_space<any>>) target_semaphore(%41 : memref<!tpu.dma_semaphore, #tpu.memory_space<semaphore_mem>>)
      %c2 = arith.constant 2 : index
      %42 = memref.load %arg1[%c2] : memref<4xi32, #tpu.memory_space<smem>>
      %c2_i32 = arith.constant 2 : i32
      %c2_i32_29 = arith.constant 2 : i32
      %c2_i32_30 = arith.constant 2 : i32
      %c0_i32_31 = arith.constant 0 : i32
      %43 = tpu.memref_slice %arg9[%c2_i32_30, %c0_i32_31] : memref<4x128xf32, #tpu.memory_space<vmem>> -> memref<1x128xf32, #tpu.memory_space<vmem>>
      %c0_i32_32 = arith.constant 0 : i32
      %44 = tpu.memref_slice %arg6[%c2_i32, %42, %c0_i32_32] : memref<4x8x128xf32, #tpu.memory_space<any>> -> memref<1x1x128xf32, #tpu.memory_space<any>>
      %45 = tpu.memref_squeeze %44 : memref<1x1x128xf32, #tpu.memory_space<any>> -> memref<1x128xf32, #tpu.memory_space<any>>
      %46 = tpu.memref_slice %arg10[%c2_i32_29] : memref<4x!tpu.dma_semaphore, #tpu.memory_space<semaphore_mem>> -> memref<1x!tpu.dma_semaphore, #tpu.memory_space<semaphore_mem>>
      %47 = tpu.memref_squeeze %46 : memref<1x!tpu.dma_semaphore, #tpu.memory_space<semaphore_mem>> -> memref<!tpu.dma_semaphore, #tpu.memory_space<semaphore_mem>>
      tpu.enqueue_dma source(%43 : memref<1x128xf32, #tpu.memory_space<vmem>>) target(%45 : memref<1x128xf32, #tpu.memory_space<any>>) target_semaphore(%47 : memref<!tpu.dma_semaphore, #tpu.memory_space<semaphore_mem>>)
      %c3 = arith.constant 3 : index
      %48 = memref.load %arg1[%c3] : memref<4xi32, #tpu.memory_space<smem>>
      %c3_i32 = arith.constant 3 : i32
      %c3_i32_33 = arith.constant 3 : i32
      %c3_i32_34 = arith.constant 3 : i32
      %c0_i32_35 = arith.constant 0 : i32
      %49 = tpu.memref_slice %arg9[%c3_i32_34, %c0_i32_35] : memref<4x128xf32, #tpu.memory_space<vmem>> -> memref<1x128xf32, #tpu.memory_space<vmem>>
      %c0_i32_36 = arith.constant 0 : i32
      %50 = tpu.memref_slice %arg6[%c3_i32, %48, %c0_i32_36] : memref<4x8x128xf32, #tpu.memory_space<any>> -> memref<1x1x128xf32, #tpu.memory_space<any>>
      %51 = tpu.memref_squeeze %50 : memref<1x1x128xf32, #tpu.memory_space<any>> -> memref<1x128xf32, #tpu.memory_space<any>>
      %52 = tpu.memref_slice %arg10[%c3_i32_33] : memref<4x!tpu.dma_semaphore, #tpu.memory_space<semaphore_mem>> -> memref<1x!tpu.dma_semaphore, #tpu.memory_space<semaphore_mem>>
      %53 = tpu.memref_squeeze %52 : memref<1x!tpu.dma_semaphore, #tpu.memory_space<semaphore_mem>> -> memref<!tpu.dma_semaphore, #tpu.memory_space<semaphore_mem>>
      tpu.enqueue_dma source(%49 : memref<1x128xf32, #tpu.memory_space<vmem>>) target(%51 : memref<1x128xf32, #tpu.memory_space<any>>) target_semaphore(%53 : memref<!tpu.dma_semaphore, #tpu.memory_space<semaphore_mem>>)
      %c0_i32_37 = arith.constant 0 : i32
      %c0_i32_38 = arith.constant 0 : i32
      %c0_i32_39 = arith.constant 0 : i32
      %c0_i32_40 = arith.constant 0 : i32
      %54 = tpu.memref_slice %arg9[%c0_i32_39, %c0_i32_40] : memref<4x128xf32, #tpu.memory_space<vmem>> -> memref<1x128xf32, #tpu.memory_space<vmem>>
      %c0_i32_41 = arith.constant 0 : i32
      %55 = tpu.memref_slice %arg6[%c0_i32_37, %30, %c0_i32_41] : memref<4x8x128xf32, #tpu.memory_space<any>> -> memref<1x1x128xf32, #tpu.memory_space<any>>
      %56 = tpu.memref_squeeze %55 : memref<1x1x128xf32, #tpu.memory_space<any>> -> memref<1x128xf32, #tpu.memory_space<any>>
      %57 = tpu.memref_slice %arg10[%c0_i32_38] : memref<4x!tpu.dma_semaphore, #tpu.memory_space<semaphore_mem>> -> memref<1x!tpu.dma_semaphore, #tpu.memory_space<semaphore_mem>>
      %58 = tpu.memref_squeeze %57 : memref<1x!tpu.dma_semaphore, #tpu.memory_space<semaphore_mem>> -> memref<!tpu.dma_semaphore, #tpu.memory_space<semaphore_mem>>
      tpu.wait_dma2 semaphore(%58 : memref<!tpu.dma_semaphore, #tpu.memory_space<semaphore_mem>>) src(%54 : memref<1x128xf32, #tpu.memory_space<vmem>>) dst(%56 : memref<1x128xf32, #tpu.memory_space<any>>)
      %c1_i32_42 = arith.constant 1 : i32
      %c1_i32_43 = arith.constant 1 : i32
      %c1_i32_44 = arith.constant 1 : i32
      %c0_i32_45 = arith.constant 0 : i32
      %59 = tpu.memref_slice %arg9[%c1_i32_44, %c0_i32_45] : memref<4x128xf32, #tpu.memory_space<vmem>> -> memref<1x128xf32, #tpu.memory_space<vmem>>
      %c0_i32_46 = arith.constant 0 : i32
      %60 = tpu.memref_slice %arg6[%c1_i32_42, %36, %c0_i32_46] : memref<4x8x128xf32, #tpu.memory_space<any>> -> memref<1x1x128xf32, #tpu.memory_space<any>>
      %61 = tpu.memref_squeeze %60 : memref<1x1x128xf32, #tpu.memory_space<any>> -> memref<1x128xf32, #tpu.memory_space<any>>
      %62 = tpu.memref_slice %arg10[%c1_i32_43] : memref<4x!tpu.dma_semaphore, #tpu.memory_space<semaphore_mem>> -> memref<1x!tpu.dma_semaphore, #tpu.memory_space<semaphore_mem>>
      %63 = tpu.memref_squeeze %62 : memref<1x!tpu.dma_semaphore, #tpu.memory_space<semaphore_mem>> -> memref<!tpu.dma_semaphore, #tpu.memory_space<semaphore_mem>>
      tpu.wait_dma2 semaphore(%63 : memref<!tpu.dma_semaphore, #tpu.memory_space<semaphore_mem>>) src(%59 : memref<1x128xf32, #tpu.memory_space<vmem>>) dst(%61 : memref<1x128xf32, #tpu.memory_space<any>>)
      %c2_i32_47 = arith.constant 2 : i32
      %c2_i32_48 = arith.constant 2 : i32
      %c2_i32_49 = arith.constant 2 : i32
      %c0_i32_50 = arith.constant 0 : i32
      %64 = tpu.memref_slice %arg9[%c2_i32_49, %c0_i32_50] : memref<4x128xf32, #tpu.memory_space<vmem>> -> memref<1x128xf32, #tpu.memory_space<vmem>>
      %c0_i32_51 = arith.constant 0 : i32
      %65 = tpu.memref_slice %arg6[%c2_i32_47, %42, %c0_i32_51] : memref<4x8x128xf32, #tpu.memory_space<any>> -> memref<1x1x128xf32, #tpu.memory_space<any>>
      %66 = tpu.memref_squeeze %65 : memref<1x1x128xf32, #tpu.memory_space<any>> -> memref<1x128xf32, #tpu.memory_space<any>>
      %67 = tpu.memref_slice %arg10[%c2_i32_48] : memref<4x!tpu.dma_semaphore, #tpu.memory_space<semaphore_mem>> -> memref<1x!tpu.dma_semaphore, #tpu.memory_space<semaphore_mem>>
      %68 = tpu.memref_squeeze %67 : memref<1x!tpu.dma_semaphore, #tpu.memory_space<semaphore_mem>> -> memref<!tpu.dma_semaphore, #tpu.memory_space<semaphore_mem>>
      tpu.wait_dma2 semaphore(%68 : memref<!tpu.dma_semaphore, #tpu.memory_space<semaphore_mem>>) src(%64 : memref<1x128xf32, #tpu.memory_space<vmem>>) dst(%66 : memref<1x128xf32, #tpu.memory_space<any>>)
      %c3_i32_52 = arith.constant 3 : i32
      %c3_i32_53 = arith.constant 3 : i32
      %c3_i32_54 = arith.constant 3 : i32
      %c0_i32_55 = arith.constant 0 : i32
      %69 = tpu.memref_slice %arg9[%c3_i32_54, %c0_i32_55] : memref<4x128xf32, #tpu.memory_space<vmem>> -> memref<1x128xf32, #tpu.memory_space<vmem>>
      %c0_i32_56 = arith.constant 0 : i32
      %70 = tpu.memref_slice %arg6[%c3_i32_52, %48, %c0_i32_56] : memref<4x8x128xf32, #tpu.memory_space<any>> -> memref<1x1x128xf32, #tpu.memory_space<any>>
      %71 = tpu.memref_squeeze %70 : memref<1x1x128xf32, #tpu.memory_space<any>> -> memref<1x128xf32, #tpu.memory_space<any>>
      %72 = tpu.memref_slice %arg10[%c3_i32_53] : memref<4x!tpu.dma_semaphore, #tpu.memory_space<semaphore_mem>> -> memref<1x!tpu.dma_semaphore, #tpu.memory_space<semaphore_mem>>
      %73 = tpu.memref_squeeze %72 : memref<1x!tpu.dma_semaphore, #tpu.memory_space<semaphore_mem>> -> memref<!tpu.dma_semaphore, #tpu.memory_space<semaphore_mem>>
      tpu.wait_dma2 semaphore(%73 : memref<!tpu.dma_semaphore, #tpu.memory_space<semaphore_mem>>) src(%69 : memref<1x128xf32, #tpu.memory_space<vmem>>) dst(%71 : memref<1x128xf32, #tpu.memory_space<any>>)
    } else {
    }
    return
  }
  func.func @transform_1(%arg0: i32, %arg1: memref<4xi32, #tpu.memory_space<smem>>) -> (i32, i32) {
    %c0_i32 = arith.constant 0 : i32
    %c0_i32_0 = arith.constant 0 : i32
    %c0_i32_1 = arith.constant 0 : i32
    return %c0_i32, %c0_i32_0 : i32, i32
  }
  func.func @transform_2(%arg0: i32, %arg1: memref<4xi32, #tpu.memory_space<smem>>) -> (i32, i32) {
    %c0_i32 = arith.constant 0 : i32
    %c0_i32_0 = arith.constant 0 : i32
    return %arg0, %c0_i32 : i32, i32
  }
  func.func @transform_3(%arg0: i32, %arg1: memref<4xi32, #tpu.memory_space<smem>>) -> (i32, i32) {
    %c0_i32 = arith.constant 0 : i32
    %c0_i32_0 = arith.constant 0 : i32
    return %c0_i32, %arg0 : i32, i32
  }
}

</mosaic_0001>

<bundles_post_ra>
// kernel: tpu_custom_call.1
= control target key start
LH: loop header
LB: loop body
LE: loop exit
PB: predicated region body
PF: predicated region fallthrough
CT: control target
= control target key end

     0   :  { %s751_s21 = smov [#allocation7]   ;;  %s928_s0 = inlined_call_operand.vmem [shape: s32[4], index: 0, kind: input, shape index: {}]   ;;  %s929_s1 = inlined_call_operand.hbm [shape: f32[4,8,128], index: 1, kind: input, shape index: {}, may-alias: {1,5}]   ;;  %s930_s2 = inlined_call_operand.hbm [shape: f32[4,128], index: 2, kind: input, shape index: {}]   ;;  %s931_s3 = inlined_call_operand.vmem [shape: bf16[128,128], index: 3, kind: input, shape index: {}]   ;;  %s932_s4 = inlined_call_operand.hbm [shape: f32[1,128], index: 4, kind: input, shape index: {}]   ;;  %s933_s5 = inlined_call_operand.hbm [shape: f32[4,8,128], index: 5, kind: output, shape index: {}, may-alias: {1,5}]  }
   0x1   :  { %s11_s20 = sshll.u32 %s928_s0, 4  ;;  %s12_s20 = int_to_ptr.vmem [resolvable:$true] %s11_s20 }
   0x2   :  { %14 = dma.vmem_to_smem %s12_s20, 16, %s751_s21, [#allocation6] }
   0x3   :  { %729 = dma.done.wait [#allocation6], 16 }
   0x4   :  { %730 = vsyncadd [#allocation6], 4294967280 }
   0x5   :  { %17 = sfence }
   0x6   :  { %18 = vsyncpa [#allocation9], 0  ;;  %s25_s24 = sshll.u32 %s930_s2, 4  ;;  %s26_s24 = int_to_ptr.hbm [resolvable:$true] %s25_s24 }
   0x7   :  { %19 = vsyncpa [#allocation11], 0  ;;  %s752_s25 = smov [#allocation8]   ;;  %s38_s0 = sshll.u32 %s932_s4, 4  ;;  %s39_s0 = int_to_ptr.hbm [resolvable:$true] %s38_s0 }
   0x8   :  { %s27_s26 = sshll.u32 %s752_s25, 4  ;;  %s753_s29 = smov [#allocation10]   ;;  %s28_s26 = int_to_ptr.vmem [resolvable:$true] %s27_s26 }
   0x9   :  { %30 = dma.hbm_to_vmem [thread:$0]  %s26_s24, 64, %s28_s26, [#allocation9]  }
   0xa   :  { %s40_s30 = sshll.u32 %s753_s29, 4  ;;  %s41_s30 = int_to_ptr.vmem [resolvable:$true] %s40_s30 }
   0xb   :  { %43 = dma.hbm_to_vmem [thread:$0]  %s39_s0, 16, %s41_s30, [#allocation11]  }
   0xc   :  { %731 = dma.done.wait [#allocation9], 64  }
   0xd   :  { %732 = vsyncadd [#allocation9], 4294967232 }
   0xe   :  { %733 = dma.done.wait [#allocation11], 16  }
   0xf   :  { %734 = vsyncadd [#allocation11], 4294967280  ;;  %s58_s2 = sld [smem:[#allocation7]]  ;;  %s754_s6 = smov [#allocation4]   ;;  %v755_v0 = vmov 0.0  }
  0x10   :  { %s799_s7 = sshll.u32 %s754_s6, 4  ;;  %57 = vst [vmem:[#allocation3] sm:$0xf] %v755_v0  ;;  %s408_s8 = sld [smem:[#allocation7 + $0x1]]  ;;  %s70_s7 = int_to_ptr.vmem [resolvable:$true] %s799_s7 }
  0x11   :  { %s756_s4 = smov [#allocation4 + $0x1]   ;;  %s409_s10 = sld [smem:[#allocation7 + $0x2]] }
  0x12   :  { %s802_s9 = sshll.u32 %s756_s4, 4  ;;  %s757_s11 = smov [#allocation4 + $0x2]   ;;  %s88_s9 = int_to_ptr.vmem [resolvable:$true] %s802_s9 }
  0x13   :  { %s805_s12 = sshll.u32 %s757_s11, 4  ;;  %s807_s13 = sld [smem:[#allocation7 + $0x3]]  ;;  %s106_s12 = int_to_ptr.vmem [resolvable:$true] %s805_s12 }
  0x14   :  { %s758_s17 = smov [#allocation4 + $0x3]   ;;  %s821_s28 = scalar_lea.hbm %s929_s1, 32 }
  0x15   :  { %s59_s16 = scalar_lea.hbm %s929_s1, %s58_s2  ;;  %s813_s18 = sshll.u32 %s758_s17, 4  ;;  %s124_s18 = int_to_ptr.vmem [resolvable:$true] %s813_s18 }
  0x16   :  { %s67_s19 = sshll.u32 %s59_s16, 4  ;;  %s395_s22 = scalar_lea.hbm %s929_s1, %s408_s8  ;;  %s68_s19 = int_to_ptr.hbm [resolvable:$true] %s67_s19 }
  0x17   :  { %s396_s23 = scalar_lea.hbm %s395_s22, 8  ;;  %s537_s24 = sshra.s32 %s68_s19, 4  ;;  %s538_s24 = int_to_ptr.hbm [resolvable:$true] %s537_s24 }
  0x18   :  { %s539_s25 = scalar_lea.hbm %s538_s24, 1  ;;  %p542_p1 = scmp.lt.s32.totalorder %s538_s24, %s929_s1 }
  0x19   :  { %p540_p0 = scmp.ne.s32.totalorder %s538_s24, %s539_s25  ;;  %p543_p2 = scmp.lt.s32.totalorder %s821_s28, %s539_s25 }
  0x1b   :  { %p544_p3 = por %p543_p2, %p542_p1 }
  0x1d   :  { %p545_p4 = pnand %p544_p3, %p540_p0 }
  0x1f   :  { %548 = shalt.err (!%p545_p4)  }
  0x20   :  { %72 = dma.hbm_to_vmem [thread:$0]  %s68_s19, 16, %s70_s7, [#allocation5] }
  0x21   :  { %s85_s30 = sshll.u32 %s396_s23, 4  ;;  %s397_s8 = scalar_lea.hbm %s929_s1, %s409_s10  ;;  %s86_s30 = int_to_ptr.hbm [resolvable:$true] %s85_s30 }
  0x22   :  { %s398_s4 = scalar_lea.hbm %s397_s8, 16  ;;  %s561_s11 = sshra.s32 %s86_s30, 4  ;;  %s562_s11 = int_to_ptr.hbm [resolvable:$true] %s561_s11 }
  0x23   :  { %s563_s14 = scalar_lea.hbm %s562_s11, 1  ;;  %p566_p6 = scmp.lt.s32.totalorder %s562_s11, %s929_s1 }
  0x24   :  { %p564_p5 = scmp.ne.s32.totalorder %s562_s11, %s563_s14  ;;  %p567_p7 = scmp.lt.s32.totalorder %s821_s28, %s563_s14 }
  0x26   :  { %p568_p8 = por %p567_p7, %p566_p6 }
  0x28   :  { %p569_p9 = pnand %p568_p8, %p564_p5 }
  0x2a   :  { %572 = shalt.err (!%p569_p9)  }
  0x2b   :  { %90 = dma.hbm_to_vmem [thread:$0]  %s86_s30, 16, %s88_s9, [#allocation5 + $0x1] }
  0x2c   :  { %s103_s10 = sshll.u32 %s398_s4, 4  ;;  %s399_s20 = scalar_lea.hbm %s929_s1, %s807_s13  ;;  %s104_s10 = int_to_ptr.hbm [resolvable:$true] %s103_s10 }
  0x2d   :  { %s400_s21 = scalar_lea.hbm %s399_s20, 24  ;;  %s585_s22 = sshra.s32 %s104_s10, 4  ;;  %s586_s22 = int_to_ptr.hbm [resolvable:$true] %s585_s22 }
  0x2e   :  { %s587_s23 = scalar_lea.hbm %s586_s22, 1  ;;  %p590_p11 = scmp.lt.s32.totalorder %s586_s22, %s929_s1 }
  0x2f   :  { %p588_p10 = scmp.ne.s32.totalorder %s586_s22, %s587_s23  ;;  %p591_p12 = scmp.lt.s32.totalorder %s821_s28, %s587_s23 }
  0x31   :  { %p592_p13 = por %p591_p12, %p590_p11 }
  0x33   :  { %p593_p0 = pnand %p592_p13, %p588_p10 }
  0x35   :  { %596 = shalt.err (!%p593_p0)  }
  0x36   :  { %108 = dma.hbm_to_vmem [thread:$0]  %s104_s10, 16, %s106_s12, [#allocation5 + $0x2] }
  0x37   :  { %s121_s13 = sshll.u32 %s400_s21, 4  ;;  %s122_s13 = int_to_ptr.hbm [resolvable:$true] %s121_s13 }
  0x38   :  { %s609_s26 = sshra.s32 %s122_s13, 4  ;;  %s610_s26 = int_to_ptr.hbm [resolvable:$true] %s609_s26 }
  0x39   :  { %s611_s27 = scalar_lea.hbm %s610_s26, 1  ;;  %p614_p2 = scmp.lt.s32.totalorder %s610_s26, %s929_s1 }
  0x3a   :  { %p612_p1 = scmp.ne.s32.totalorder %s610_s26, %s611_s27  ;;  %p615_p3 = scmp.lt.s32.totalorder %s821_s28, %s611_s27 }
  0x3c   :  { %p616_p4 = por %p615_p3, %p614_p2 }
  0x3e   :  { %p617_p5 = pnand %p616_p4, %p612_p1 }
  0x40   :  { %620 = shalt.err (!%p617_p5)  }
  0x41   :  { %126 = dma.hbm_to_vmem [thread:$0]  %s122_s13, 16, %s124_s18, [#allocation5 + $0x3] }
  0x42   :  { %735 = dma.done.wait [#allocation5], 16 }
  0x43   :  { %736 = vsyncadd [#allocation5], 4294967280 }
  0x44   :  { %737 = dma.done.wait [#allocation5 + $0x1], 16 }
  0x45   :  { %738 = vsyncadd [#allocation5 + $0x1], 4294967280 }
  0x46   :  { %739 = dma.done.wait [#allocation5 + $0x2], 16 }
  0x47   :  { %740 = vsyncadd [#allocation5 + $0x2], 4294967280 }
  0x48   :  { %741 = dma.done.wait [#allocation5 + $0x3], 16 }
  0x49   :  { %742 = vsyncadd [#allocation5 + $0x3], 4294967280  ;;  %v462_v1 = vld [vmem:[%s931_s3 + $0x38] sm:$0xff]  ;;  %v461_v2 = vld [vmem:[%s931_s3 + $0x30] sm:$0xff]  ;;  %v759_v12 = vmov 0   ;;  %s449_s22 = sld [smem:[#allocation7 + $0x2]] }
  0x4a   :  { %219 = vmatpush.bf16.xpose.msra.mxu0 %v462_v1  ;;  %267 = vmatpush.bf16.msra.mxu1 %v462_v1  ;;  %v460_v3 = vld [vmem:[%s931_s3 + $0x28] sm:$0xff]  ;;  %v459_v4 = vld [vmem:[%s931_s3 + $0x20] sm:$0xff]  ;;  %v458_v5 = vld [vmem:[%s931_s3 + $0x18] sm:$0xff]  ;;  %136 = vst [vmem:[#allocation2] sm:$0xf] %v759_v12  ;;  %s450_s23 = sld [smem:[#allocation7 + $0x3]] }
  0x4b   :  { %v141_v6 = vld [vmem:[#allocation8] sm:$0xf]  ;;  %v138_v9 = vld [vmem:[#allocation4] sm:$0xf]  ;;  %137 = vst [vmem:[#allocation2 + $0x4] sm:$0xf] %v759_v12 }
  0x4c   :  { %v457_v7 = vld [vmem:[%s931_s3 + $0x10] sm:$0xff]  ;;  %v142_v8 = vpack.c.bf16 %v141_v6, %v141_v6  ;;  %v139_v10 = vpack.c.bf16 %v138_v9, %v138_v9  ;;  %v456_v13 = vld [vmem:[%s931_s3 + $0x8] sm:$0xff]  ;;  %v455_v14 = vld [vmem:[%s931_s3] sm:$0xff]  ;;  %s448_s3 = sld [smem:[#allocation7 + $0x1]] }
  0x4d   :  { %v232_v16 = vld [vmem:[#allocation10] sm:$0x1]  ;;  %s287_s24 = sld [smem:[#allocation7]]  ;;  %v265_v40 = vld [vmem:[#allocation3] sm:$0xf] }
  0x4e   :  { %268 = vmatpush.bf16.msra.mxu1 %v461_v2  ;;  %v144_v11 = vrot.slane %v142_v8, 6  ;;  %140 = vst [vmem:[#allocation2] sm:$0x3] %v139_v10  ;;  %v447_v17 = vmul.f32 -100.0, %v232_v16 }
  0x4f   :  { %s404_s29 = scalar_lea.hbm %s933_s5, %s449_s22  ;;  %s898_s22 = scalar_lea.hbm %s933_s5, 32 }
  0x50   :  { %146 = vst [vmem:[#allocation2] sm:$0xc] %v144_v11  ;;  %v235_v18 = vmul.f32 1.442695, %v447_v17  ;;  %s406_s1 = scalar_lea.hbm %s933_s5, %s450_s23  ;;  %s405_s11 = scalar_lea.hbm %s404_s29, 16 }
  0x51   :  { %s407_s14 = scalar_lea.hbm %s406_s1, 24  ;;  %s334_s10 = sshll.u32 %s405_s11, 4  ;;  %s891_s10 = int_to_ptr.hbm [resolvable:$true] %s334_s10 }
  0x52   :  { %220 = vmatpush.bf16.xpose.msra.mxu0 %v461_v2  ;;  %269 = vmatpush.bf16.msra.mxu1 %v460_v3  ;;  %473 = vpow2.f32 %v235_v18  ;;  %s402_s26 = scalar_lea.hbm %s933_s5, %s448_s3  ;;  %s352_s17 = sshll.u32 %s407_s14, 4  ;;  %s893_s17 = int_to_ptr.hbm [resolvable:$true] %s352_s17 }
  0x53   :  { %s288_s8 = scalar_lea.hbm %s933_s5, %s287_s24  ;;  %s403_s4 = scalar_lea.hbm %s402_s26, 8 }
  0x54   :  { %s298_s15 = sshll.u32 %s288_s8, 4  ;;  %s316_s16 = sshll.u32 %s403_s4, 4  ;;  %s299_s15 = int_to_ptr.hbm [resolvable:$true] %s298_s15  ;;  %s317_s16 = int_to_ptr.hbm [resolvable:$true] %s316_s16 }
  0x55   :  { %s645_s19 = sshra.s32 %s299_s15, 4  ;;  %s646_s19 = int_to_ptr.hbm [resolvable:$true] %s645_s19 }
  0x56   :  { %270 = vmatpush.bf16.msra.mxu1 %v459_v4  ;;  %s647_s20 = scalar_lea.hbm %s646_s19, 1  ;;  %p650_p7 = scmp.lt.s32.totalorder %s646_s19, %s933_s5 }
  0x57   :  { %v463_v15 = vld [vmem:[#allocation2] sm:$0xff]  ;;  %p648_p6 = scmp.ne.s32.totalorder %s646_s19, %s647_s20  ;;  %p651_p8 = scmp.lt.s32.totalorder %s898_s22, %s647_s20 }
  0x58   :  { %v474_v19 = vpop.eup %473 }
  0x59   :  { %v237_v20 = vadd.f32 1.0, %v474_v19  ;;  %p652_p9 = por %p651_p8, %p650_p7 }
  0x5a   :  { %221 = vmatpush.bf16.xpose.msra.mxu0 %v460_v3  ;;  %271 = vmatpush.bf16.msra.mxu1 %v458_v5 }
  0x5b   :  { %475 = vrcp.f32 %v237_v20  ;;  %vm243_vm0 = vweird.f32 %v237_v20  ;;  %v249_v25 = vand.u32 2147483648, %v237_v20  ;;  %v247_v27 = vand.u32 2147483647, %v237_v20  ;;  %p653_p10 = pnand %p652_p9, %p648_p6 }
  0x5d   :  { %v250_v28 = vor.u32 1.1754944e-38, %v249_v25  ;;  %vm248_vm3 = vcmp.eq.f32.partialorder %v247_v27, 8.507059e+37 }
  0x5e   :  { %272 = vmatpush.bf16.msra.mxu1 %v457_v7 }
  0x61   :  { %v476_v21 = vpop.eup %475 }
  0x62   :  { %222 = vmatpush.bf16.xpose.msra.mxu0 %v459_v4  ;;  %273 = vmatpush.bf16.msra.mxu1 %v456_v13  ;;  %v239_v22 = vmul.f32 %v476_v21, %v237_v20  ;;  %vm244_vm1 = vweird.f32 %v476_v21 }
  0x63   :  { %vm245_vm2 = vmor %vm243_vm0, %vm244_vm1 }
  0x64   :  { %v240_v23 = vsub.f32 1.0, %v239_v22 }
  0x66   :  { %274 = vmatpush.bf16.msra.mxu1 %v455_v14  ;;  %v241_v24 = vmul.f32 %v476_v21, %v240_v23 }
  0x68   :  { %v242_v26 = vadd.f32 %v476_v21, %v241_v24 }
  0x6a   :  { %223 = vmatpush.bf16.xpose.msra.mxu0 %v458_v5  ;;  %v246_v29 = vsel %vm245_vm2, %v476_v21, %v242_v26 }
  0x6b   :  { %v251_v30 = vsel %vm248_vm3, %v250_v28, %v246_v29 }
  0x6c   :  { %v258_v33 = vperm.slane %v251_v30, 0 }
  0x72   :  { %224 = vmatpush.bf16.xpose.msra.mxu0 %v457_v7 }
  0x7a   :  { %225 = vmatpush.bf16.xpose.msra.mxu0 %v456_v13 }
  0x82   :  { %226 = vmatpush.bf16.xpose.msra.mxu0 %v455_v14 }
  0x89   :  { %227 = vmatmul.bf16.vlgmr.msra.gmra.mxu0 %v463_v15 }
 0x106   :  { %v228_v31 = vpop.f32.mrf.mxu0 }
 0x107   :  { %v254_v32 = vrot.slane %v228_v31, 4 }
 0x109   :  { %v256_v34 = vsub.f32 %v228_v31, %v254_v32 }
 0x10b   :  { %v260_v35 = vmul.f32 %v258_v33, %v256_v34 }
 0x10d   :  { %v262_v36 = vrot.slane %v260_v35, 4 }
 0x10e   :  { %v230_v37 = vpop.f32.mrf.mxu0 }
 0x10f   :  { %v264_v38 = vadd.f32 %v262_v36, %v228_v31 }
 0x111   :  { %v266_v39 = vpack.c.bf16 %v264_v38, %v264_v38 }
 0x113   :  { %275 = vmatmul.bf16.vlgmr.msra.gmra.mxu1 %v266_v39 }
 0x190   :  { %v276_v41 = vpop.f32.mrf.mxu1 }
 0x191   :  { %v280_v42 = vadd.f32 %v276_v41, %v265_v40 }
 0x193   :  { %281 = vst [vmem:[#allocation3] sm:$0xf] %v280_v42 }
 0x198   :  { %v278_v43 = vpop.f32.mrf.mxu1 }
 0x19a   :  { %v285_v44 = vld [vmem:[#allocation3] sm:$0xf] }
 0x19b   :  { %286 = vst [vmem:[#allocation4] sm:$0xf] %v285_v44 }
 0x19c   :  { %656 = shalt.err (!%p653_p10)  }
 0x19d   :  { %301 = dma.vmem_to_hbm [thread:$0]  %s70_s7, 16, %s299_s15, [#allocation5] }
 0x19e   :  { %s669_s25 = sshra.s32 %s317_s16, 4  ;;  %s670_s25 = int_to_ptr.hbm [resolvable:$true] %s669_s25 }
 0x19f   :  { %s671_s13 = scalar_lea.hbm %s670_s25, 1  ;;  %p674_p12 = scmp.lt.s32.totalorder %s670_s25, %s933_s5 }
 0x1a0   :  { %p672_p11 = scmp.ne.s32.totalorder %s670_s25, %s671_s13  ;;  %p675_p13 = scmp.lt.s32.totalorder %s898_s22, %s671_s13 }
 0x1a2   :  { %p676_p0 = por %p675_p13, %p674_p12 }
 0x1a4   :  { %p677_p1 = pnand %p676_p0, %p672_p11 }
 0x1a6   :  { %680 = shalt.err (!%p677_p1)  }
 0x1a7   :  { %319 = dma.vmem_to_hbm [thread:$0]  %s88_s9, 16, %s317_s16, [#allocation5 + $0x1] }
 0x1a8   :  { %s693_s0 = sshra.s32 %s891_s10, 4  ;;  %s694_s0 = int_to_ptr.hbm [resolvable:$true] %s693_s0 }
 0x1a9   :  { %s695_s7 = scalar_lea.hbm %s694_s0, 1  ;;  %p698_p3 = scmp.lt.s32.totalorder %s694_s0, %s933_s5 }
 0x1aa   :  { %p696_p2 = scmp.ne.s32.totalorder %s694_s0, %s695_s7  ;;  %p699_p4 = scmp.lt.s32.totalorder %s898_s22, %s695_s7 }
 0x1ac   :  { %p700_p5 = por %p699_p4, %p698_p3 }
 0x1ae   :  { %p701_p6 = pnand %p700_p5, %p696_p2 }
 0x1b0   :  { %704 = shalt.err (!%p701_p6)  }
 0x1b1   :  { %337 = dma.vmem_to_hbm [thread:$0]  %s106_s12, 16, %s891_s10, [#allocation5 + $0x2] }
 0x1b2   :  { %s717_s2 = sshra.s32 %s893_s17, 4  ;;  %s718_s2 = int_to_ptr.hbm [resolvable:$true] %s717_s2 }
 0x1b3   :  { %s719_s9 = scalar_lea.hbm %s718_s2, 1  ;;  %p722_p8 = scmp.lt.s32.totalorder %s718_s2, %s933_s5 }
 0x1b4   :  { %p720_p7 = scmp.ne.s32.totalorder %s718_s2, %s719_s9  ;;  %p723_p9 = scmp.lt.s32.totalorder %s898_s22, %s719_s9 }
 0x1b6   :  { %p724_p10 = por %p723_p9, %p722_p8 }
 0x1b8   :  { %p725_p11 = pnand %p724_p10, %p720_p7 }
 0x1ba   :  { %728 = shalt.err (!%p725_p11)  }
 0x1bb   :  { %355 = dma.vmem_to_hbm [thread:$0]  %s124_s18, 16, %s893_s17, [#allocation5 + $0x3] }
 0x1bc   :  { %743 = dma.done.wait [#allocation5], 16 }
 0x1bd   :  { %744 = vsyncadd [#allocation5], 4294967280 }
 0x1be   :  { %745 = dma.done.wait [#allocation5 + $0x1], 16 }
 0x1bf   :  { %746 = vsyncadd [#allocation5 + $0x1], 4294967280 }
 0x1c0   :  { %747 = dma.done.wait [#allocation5 + $0x2], 16 }
 0x1c1   :  { %748 = vsyncadd [#allocation5 + $0x2], 4294967280 }
 0x1c2   :  { %749 = dma.done.wait [#allocation5 + $0x3], 16 }
 0x1c3   :  { %750 = vsyncadd [#allocation5 + $0x3], 4294967280 }
 0x1c4   :  { %365 = vsyncpa [#allocation9], 1 }
 0x1c5   :  { %366 = vsyncpa [#allocation11], 1 }
 0x1c6   :  { %367 = vsyncmov [#allocation5] }
 0x1c9   :  { %s368_s5 = vpop.sfrf %367 }
 0x1ca   :  { %p451_p12 = scmp.ne.s32.totalorder %s368_s5, 0 }
 0x1cc   :  { %372 = shalt.err (%p451_p12)  }
 0x1cd   :  { %374 = vsyncmov [#allocation5 + $0x1] }
 0x1d0   :  { %s375_s12 = vpop.sfrf %374 }
 0x1d1   :  { %p452_p13 = scmp.ne.s32.totalorder %s375_s12, 0 }
 0x1d3   :  { %379 = shalt.err (%p452_p13)  }
 0x1d4   :  { %381 = vsyncmov [#allocation5 + $0x2] }
 0x1d7   :  { %s382_s18 = vpop.sfrf %381 }
 0x1d8   :  { %p453_p0 = scmp.ne.s32.totalorder %s382_s18, 0 }
 0x1da   :  { %386 = shalt.err (%p453_p0)  }
 0x1db   :  { %388 = vsyncmov [#allocation5 + $0x3] }
 0x1de   :  { %s389_s6 = vpop.sfrf %388 }
 0x1df   :  { %p454_p1 = scmp.ne.s32.totalorder %s389_s6, 0 }
 0x1e1   :  { %393 = shalt.err (%p454_p1)  }

</bundles_post_ra>
